<compile_context>
chip_gen: v7x
topology: tpu7x:2x2x1
jax: 0.10.0
libtpu: 0.0.40
codegen_flags: <defaults>
</compile_context>

<pallas_src>
import functools
import math

import jax
import jax.numpy as jnp
import numpy as np
from jax import lax
from jax.experimental import pallas as pl
from jax.experimental.pallas import tpu as pltpu


# ----------------------------- Pallas kernel -------------------------------

def transformer_layer_kernel(
    x_ref,                                   # (S, D)      one batch, f32
    ln1_g, ln1_b,                            # (1, D)      f32
    wqkv_ref, bqkv_ref,                      # (D, 3dk) bf16 / (1, 3dk) f32  (this head)
    wo_ref, bo_ref,                          # (dk, D) bf16 / (1, D) f32     (this head / shared)
    ln2_g, ln2_b,                            # (1, D)      f32
    w1_ref, b1_ref,                          # (D, Dff) bf16 / (1, Dff) f32
    w2_ref, b2_ref,                          # (Dff, D) bf16 / (1, D) f32
    o_ref,                                   # (S, D)      output block (written at last head)
    acc_ref,                                 # (S, D)      f32 VMEM scratch: sum over heads
    *, heads: int, d_k: int,
):
    h = pl.program_id(1)

    @pl.when(h == 0)
    def _():
        acc_ref[...] = jnp.zeros_like(acc_ref)

    x = x_ref[...].astype(jnp.float32)                       # (S, D)

    # ---- LN1 (f32; recomputed per head — VPU-cheap vs. the matmuls) ----
    mu = jnp.mean(x, axis=-1, keepdims=True)
    var = jnp.mean((x - mu) ** 2, axis=-1, keepdims=True)
    z = (x - mu) * lax.rsqrt(var + 1e-5) * ln1_g[...] + ln1_b[...]

    # ---- this head's Q/K/V projection (bf16 operands, f32 accumulate) ----
    qkv = jnp.dot(z.astype(jnp.bfloat16), wqkv_ref[...],
                  preferred_element_type=jnp.float32) + bqkv_ref[...]   # (S, 3dk)
    q = qkv[:, :d_k]
    k = qkv[:, d_k:2 * d_k]
    v = qkv[:, 2 * d_k:]

    # ---- attention for this head (softmax in f32, matmuls in bf16) ----
    scale = 1.0 / math.sqrt(d_k)
    s = lax.dot_general(q.astype(jnp.bfloat16), k.astype(jnp.bfloat16),
                        dimension_numbers=(((1,), (1,)), ((), ())),
                        preferred_element_type=jnp.float32) * scale      # (S, S)
    m = jnp.max(s, axis=-1, keepdims=True)
    e = jnp.exp(s - m)
    p = e * pl.reciprocal(jnp.sum(e, axis=-1, keepdims=True), approx=True)
    ctx = jnp.dot(p.astype(jnp.bfloat16), v.astype(jnp.bfloat16),
                  preferred_element_type=jnp.float32)                    # (S, dk)

    # accumulate this head's contribution to the attention output projection
    acc_ref[...] += jnp.dot(ctx.astype(jnp.bfloat16), wo_ref[...],
                            preferred_element_type=jnp.float32)          # (S, D)

    # ---- after the last head: residual, LN2, FFN, residual ----
    @pl.when(h == heads - 1)
    def _():
        x1 = x + acc_ref[...] + bo_ref[...]                  # residual (dropout = id)
        mu2 = jnp.mean(x1, axis=-1, keepdims=True)
        var2 = jnp.mean((x1 - mu2) ** 2, axis=-1, keepdims=True)
        z2 = (x1 - mu2) * lax.rsqrt(var2 + 1e-5) * ln2_g[...] + ln2_b[...]
        h1 = jnp.maximum(
            jnp.dot(z2.astype(jnp.bfloat16), w1_ref[...],
                    preferred_element_type=jnp.float32) + b1_ref[...], 0.0)
        ff = jnp.dot(h1.astype(jnp.bfloat16), w2_ref[...],
                     preferred_element_type=jnp.float32) + b2_ref[...]
        o_ref[...] = (x1 + ff).astype(o_ref.dtype)


# --------------------------- one-time weight packing -------------------------

def pack_params(params, *, heads, matmul_dtype=jnp.bfloat16):
    """Pack per-head QKV / output-projection weights once (not per forward call)."""
    D = params["wq"].shape[0]
    d_k = D // heads

    def per_head_cols(w):                      # (D, D) -> (H, D, d_k)
        return jnp.transpose(w.reshape(D, heads, d_k), (1, 0, 2))

    w_qkv_h = jnp.concatenate(
        [per_head_cols(params["wq"]),
         per_head_cols(params["wk"]),
         per_head_cols(params["wv"])], axis=-1).astype(matmul_dtype)   # (H, D, 3dk)
    b_qkv_h = jnp.concatenate(
        [params["bq"].reshape(heads, 1, d_k),
         params["bk"].reshape(heads, 1, d_k),
         params["bv"].reshape(heads, 1, d_k)], axis=-1)                # (H, 1, 3dk) f32
    wo_h = params["wo"].reshape(heads, d_k, D).astype(matmul_dtype)    # (H, dk, D)

    return {
        "ln1_g": params["ln1_g"], "ln1_b": params["ln1_b"],
        "w_qkv_h": w_qkv_h, "b_qkv_h": b_qkv_h,
        "wo_h": wo_h, "bo": params["bo"],
        "ln2_g": params["ln2_g"], "ln2_b": params["ln2_b"],
        "w1": params["w1"].astype(matmul_dtype), "b1": params["b1"],
        "w2": params["w2"].astype(matmul_dtype), "b2": params["b2"],
    }


# ------------------------------- wrapper ------------------------------------

def transformer_layer(x, packed, *, heads):
    """x: [seq_len, batch, d_model] -> [seq_len, batch, d_model]."""
    S, B, D = x.shape
    d_k = D // heads
    Dff = packed["w1"].shape[1]

    # Stream activations per batch; [B, S, D] keeps the block trailing dims
    # equal to the full array dims (and lane-dense on D).
    xb = jnp.transpose(x, (1, 0, 2))                     # (B, S, D)

    const = lambda b, h: (0, 0)                          # weights resident in VMEM
    head = lambda b, h: (h, 0, 0)                        # per-head weight block
    in_specs = [
        pl.BlockSpec((None, S, D), lambda b, h: (b, 0, 0)),          # x
        pl.BlockSpec((1, D), const), pl.BlockSpec((1, D), const),    # ln1
        pl.BlockSpec((None, D, 3 * d_k), head),                      # w_qkv (head)
        pl.BlockSpec((None, 1, 3 * d_k), head),                      # b_qkv (head)
        pl.BlockSpec((None, d_k, D), head),                          # wo (head)
        pl.BlockSpec((1, D), const),                                 # bo
        pl.BlockSpec((1, D), const), pl.BlockSpec((1, D), const),    # ln2
        pl.BlockSpec((D, Dff), const), pl.BlockSpec((1, Dff), const),  # w1, b1
        pl.BlockSpec((Dff, D), const), pl.BlockSpec((1, D), const),    # w2, b2
    ]
    out_spec = pl.BlockSpec((None, S, D), lambda b, h: (b, 0, 0))

    # VMEM budget from the actual block footprint (double-buffered) + scratch,
    # capped well below a v7x TensorCore's 64 MiB.
    blocks = [
        ((S, D), 4), ((1, D), 4), ((1, D), 4),
        ((D, 3 * d_k), 2), ((1, 3 * d_k), 4),
        ((d_k, D), 2), ((1, D), 4),
        ((1, D), 4), ((1, D), 4),
        ((D, Dff), 2), ((1, Dff), 4), ((Dff, D), 2), ((1, D), 4),
        ((S, D), 4),                                     # output block
    ]
    footprint = 2 * sum(int(np.prod(s)) * b for s, b in blocks) + S * D * 4
    vmem_limit = int(min(48 * 1024 * 1024, max(16 * 1024 * 1024, 4 * footprint)))

    kernel = functools.partial(transformer_layer_kernel, heads=heads, d_k=d_k)
    out_b = pl.pallas_call(
        kernel,
        out_shape=jax.ShapeDtypeStruct((B, S, D), x.dtype),
        grid_spec=pltpu.PrefetchScalarGridSpec(
            num_scalar_prefetch=0,
            grid=(B, heads),
            in_specs=in_specs,
            out_specs=out_spec,
            scratch_shapes=[pltpu.VMEM((S, D), jnp.float32)],
        ),
        compiler_params=pltpu.CompilerParams(
            dimension_semantics=("parallel", "arbitrary"),
            vmem_limit_bytes=vmem_limit,
        ),
    )(xb,
      packed["ln1_g"], packed["ln1_b"],
      packed["w_qkv_h"], packed["b_qkv_h"],
      packed["wo_h"], packed["bo"],
      packed["ln2_g"], packed["ln2_b"],
      packed["w1"], packed["b1"], packed["w2"], packed["b2"])

    return jnp.transpose(out_b, (1, 0, 2))               # back to [S, B, D]


# --------------------------- pure-JAX reference ------------------------------

def reference_layer(x, p, *, heads):
    S, B, D = x.shape
    d_k = D // heads

    def ln(v, g, b):
        mu = jnp.mean(v, axis=-1, keepdims=True)
        var = jnp.mean((v - mu) ** 2, axis=-1, keepdims=True)
        return (v - mu) / jnp.sqrt(var + 1e-5) * g + b

    z = ln(x, p["ln1_g"][0], p["ln1_b"][0])
    q = z @ p["wq"] + p["bq"][0]
    k = z @ p["wk"] + p["bk"][0]
    v = z @ p["wv"] + p["bv"][0]
    q = q.reshape(S, B, heads, d_k)
    k = k.reshape(S, B, heads, d_k)
    v = v.reshape(S, B, heads, d_k)
    scores = jnp.einsum("ibhd,jbhd->ijbh", q, k) / math.sqrt(d_k)
    attnw = jax.nn.softmax(scores, axis=1)
    attn = jnp.einsum("ijbh,jbhd->ibhd", attnw, v).reshape(S, B, D)
    attn = attn @ p["wo"] + p["bo"][0]
    x = x + attn
    z = ln(x, p["ln2_g"][0], p["ln2_b"][0])
    ff = jnp.maximum(z @ p["w1"] + p["b1"][0], 0.0) @ p["w2"] + p["b2"][0]
    return x + ff


# ---------------------------------- main -------------------------------------

if __name__ == "__main__":
    seq_len, batch, d_model, heads, d_ff = 8, 2, 32, 4, 64

    key = jax.random.PRNGKey(0)
    ks = jax.random.split(key, 16)

    def w(k, shape):
        return jax.random.normal(k, shape, dtype=jnp.float32) * 0.05

    params = {
        "ln1_g": jnp.ones((1, d_model), jnp.float32),
        "ln1_b": jnp.zeros((1, d_model), jnp.float32),
        "wq": w(ks[0], (d_model, d_model)), "bq": w(ks[1], (1, d_model)),
        "wk": w(ks[2], (d_model, d_model)), "bk": w(ks[3], (1, d_model)),
        "wv": w(ks[4], (d_model, d_model)), "bv": w(ks[5], (1, d_model)),
        "wo": w(ks[6], (d_model, d_model)), "bo": w(ks[7], (1, d_model)),
        "ln2_g": jnp.ones((1, d_model), jnp.float32),
        "ln2_b": jnp.zeros((1, d_model), jnp.float32),
        "w1": w(ks[8], (d_model, d_ff)), "b1": w(ks[9], (1, d_ff)),
        "w2": w(ks[10], (d_ff, d_model)), "b2": w(ks[11], (1, d_model)),
    }

    x = jax.random.normal(ks[12], (seq_len, batch, d_model), dtype=jnp.float32)

    packed = pack_params(params, heads=heads)            # one-time packing
    packed = jax.tree_util.tree_map(jax.block_until_ready, packed)

    out = transformer_layer(x, packed, heads=heads)
    out = jax.block_until_ready(out)

    ref = reference_layer(x, params, heads=heads)
    # Tolerance covers bf16 matmul operands (f32 accumulation) and the EUP
    # approximate reciprocal in the softmax denominator, vs. the exact f32 ref.
    np.testing.assert_allclose(np.asarray(out), np.asarray(ref),
                               rtol=2e-2, atol=2e-2)
    print("KERNEL_OK")
</pallas_src>

<mosaic_0001>
module attributes {stable_mosaic.version = 11 : i64} {
  func.func @transformer_layer_kernel(%arg0: i32, %arg1: i32, %arg2: memref<1x8x32xf32, #tpu.memory_space<vmem>>, %arg3: memref<1x32xf32, #tpu.memory_space<vmem>>, %arg4: memref<1x32xf32, #tpu.memory_space<vmem>>, %arg5: memref<1x32x24xbf16, #tpu.memory_space<vmem>>, %arg6: memref<1x1x24xf32, #tpu.memory_space<vmem>>, %arg7: memref<1x8x32xbf16, #tpu.memory_space<vmem>>, %arg8: memref<1x32xf32, #tpu.memory_space<vmem>>, %arg9: memref<1x32xf32, #tpu.memory_space<vmem>>, %arg10: memref<1x32xf32, #tpu.memory_space<vmem>>, %arg11: memref<32x64xbf16, #tpu.memory_space<vmem>>, %arg12: memref<1x64xf32, #tpu.memory_space<vmem>>, %arg13: memref<64x32xbf16, #tpu.memory_space<vmem>>, %arg14: memref<1x32xf32, #tpu.memory_space<vmem>>, %arg15: memref<1x8x32xf32, #tpu.memory_space<vmem>>, %arg16: memref<8x32xf32, #tpu.memory_space<vmem>>) attributes {dimension_semantics = [#tpu.dimension_semantics<parallel>, #tpu.dimension_semantics<arbitrary>], iteration_bounds = array<i64: 2, 4>, scalar_prefetch = 0 : i64, scratch_operands = 1 : i64, tpu.core_type = #tpu.core_type<tc>, window_params = [{transform_indices = @transform_0, window_bounds = array<i64: 1, 8, 32>}, {pipeline_mode = #tpu.pipeline_mode<synchronous>, transform_indices = @transform_1, window_bounds = array<i64: 1, 32>}, {pipeline_mode = #tpu.pipeline_mode<synchronous>, transform_indices = @transform_2, window_bounds = array<i64: 1, 32>}, {transform_indices = @transform_3, window_bounds = array<i64: 1, 32, 24>}, {transform_indices = @transform_4, window_bounds = array<i64: 1, 1, 24>}, {transform_indices = @transform_5, window_bounds = array<i64: 1, 8, 32>}, {pipeline_mode = #tpu.pipeline_mode<synchronous>, transform_indices = @transform_6, window_bounds = array<i64: 1, 32>}, {pipeline_mode = #tpu.pipeline_mode<synchronous>, transform_indices = @transform_7, window_bounds = array<i64: 1, 32>}, {pipeline_mode = #tpu.pipeline_mode<synchronous>, transform_indices = @transform_8, window_bounds = array<i64: 1, 32>}, {pipeline_mode = #tpu.pipeline_mode<synchronous>, transform_indices = @transform_9, window_bounds = array<i64: 32, 64>}, {pipeline_mode = #tpu.pipeline_mode<synchronous>, transform_indices = @transform_10, window_bounds = array<i64: 1, 64>}, {pipeline_mode = #tpu.pipeline_mode<synchronous>, transform_indices = @transform_11, window_bounds = array<i64: 64, 32>}, {pipeline_mode = #tpu.pipeline_mode<synchronous>, transform_indices = @transform_12, window_bounds = array<i64: 1, 32>}, {transform_indices = @transform_13, window_bounds = array<i64: 1, 8, 32>}]} {
    %c0_i32 = arith.constant 0 : i32
    %0 = arith.cmpi eq, %arg1, %c0_i32 : i32
    %1 = arith.extui %0 : i1 to i32
    %c0_i32_0 = arith.constant 0 : i32
    %2 = arith.cmpi ne, %1, %c0_i32_0 : i32
    scf.if %2 {
      %cst_32 = arith.constant 0.000000e+00 : f32
      %68 = vector.broadcast %cst_32 : f32 to vector<8x32xf32>
      %c0_33 = arith.constant 0 : index
      %c0_34 = arith.constant 0 : index
      %69 = vector.load %arg16[%c0_33, %c0_34] : memref<8x32xf32, #tpu.memory_space<vmem>>, vector<8x32xf32>
      tpu.vector_store %arg16[%c0_33, %c0_34], %68 {strides = array<i32>} : memref<8x32xf32, #tpu.memory_space<vmem>>, vector<8x32xf32>,
    } else {
    }
    %c0 = arith.constant 0 : index
    %c0_1 = arith.constant 0 : index
    %c0_2 = arith.constant 0 : index
    %3 = vector.load %arg2[%c0, %c0_1, %c0_2] : memref<1x8x32xf32, #tpu.memory_space<vmem>>, vector<1x8x32xf32>
    %4 = vector.shape_cast %3 : vector<1x8x32xf32> to vector<8x32xf32>
    %cst = arith.constant dense<0.000000e+00> : vector<8xf32>
    %5 = vector.multi_reduction <add>, %4, %cst [1] : vector<8x32xf32> to vector<8xf32>
    %6 = vector.shape_cast %5 : vector<8xf32> to vector<8x1xf32>
    %cst_3 = arith.constant 3.200000e+01 : f32
    %7 = vector.broadcast %cst_3 : f32 to vector<8x1xf32>
    %8 = arith.divf %6, %7 : vector<8x1xf32>
    %9 = vector.broadcast %8 : vector<8x1xf32> to vector<8x32xf32>
    %10 = arith.subf %4, %9 : vector<8x32xf32>
    %11 = arith.mulf %10, %10 : vector<8x32xf32>
    %cst_4 = arith.constant dense<0.000000e+00> : vector<8xf32>
    %12 = vector.multi_reduction <add>, %11, %cst_4 [1] : vector<8x32xf32> to vector<8xf32>
    %13 = vector.shape_cast %12 : vector<8xf32> to vector<8x1xf32>
    %cst_5 = arith.constant 3.200000e+01 : f32
    %14 = vector.broadcast %cst_5 : f32 to vector<8x1xf32>
    %15 = arith.divf %13, %14 : vector<8x1xf32>
    %16 = vector.broadcast %8 : vector<8x1xf32> to vector<8x32xf32>
    %17 = arith.subf %4, %16 : vector<8x32xf32>
    %cst_6 = arith.constant 9.99999974E-6 : f32
    %18 = vector.broadcast %cst_6 : f32 to vector<8x1xf32>
    %19 = arith.addf %15, %18 : vector<8x1xf32>
    %20 = math.rsqrt %19 : vector<8x1xf32>
    %21 = vector.broadcast %20 : vector<8x1xf32> to vector<8x32xf32>
    %22 = arith.mulf %17, %21 : vector<8x32xf32>
    %c0_7 = arith.constant 0 : index
    %c0_8 = arith.constant 0 : index
    %23 = vector.load %arg3[%c0_7, %c0_8] : memref<1x32xf32, #tpu.memory_space<vmem>>, vector<1x32xf32>
    %24 = vector.broadcast %23 : vector<1x32xf32> to vector<8x32xf32>
    %25 = arith.mulf %22, %24 : vector<8x32xf32>
    %c0_9 = arith.constant 0 : index
    %c0_10 = arith.constant 0 : index
    %26 = vector.load %arg4[%c0_9, %c0_10] : memref<1x32xf32, #tpu.memory_space<vmem>>, vector<1x32xf32>
    %27 = vector.broadcast %26 : vector<1x32xf32> to vector<8x32xf32>
    %28 = arith.addf %25, %27 : vector<8x32xf32>
    %29 = arith.truncf %28 : vector<8x32xf32> to vector<8x32xbf16>
    %c0_11 = arith.constant 0 : index
    %c0_12 = arith.constant 0 : index
    %c0_13 = arith.constant 0 : index
    %30 = vector.load %arg5[%c0_11, %c0_12, %c0_13] : memref<1x32x24xbf16, #tpu.memory_space<vmem>>, vector<1x32x24xbf16>
    %31 = vector.shape_cast %30 : vector<1x32x24xbf16> to vector<32x24xbf16>
    %cst_14 = arith.constant dense<0.000000e+00> : vector<8x24xf32>
    %32 = tpu.matmul %29, %31, %cst_14 {dimension_numbers = #tpu.dot_dimension_numbers<[1], [0], [0], [1], [0, 0, 1, 1], [], []>} : vector<8x32xbf16>, vector<32x24xbf16>, vector<8x24xf32> -> vector<8x24xf32>
    %c0_15 = arith.constant 0 : index
    %c0_16 = arith.constant 0 : index
    %c0_17 = arith.constant 0 : index
    %33 = vector.load %arg6[%c0_15, %c0_16, %c0_17] : memref<1x1x24xf32, #tpu.memory_space<vmem>>, vector<1x1x24xf32>
    %34 = vector.shape_cast %33 : vector<1x1x24xf32> to vector<1x24xf32>
    %35 = vector.broadcast %34 : vector<1x24xf32> to vector<8x24xf32>
    %36 = arith.addf %32, %35 : vector<8x24xf32>
    %37 = vector.extract_strided_slice %36 {offsets = [0, 0], sizes = [8, 8], strides = [1, 1]} : vector<8x24xf32> to vector<8x8xf32>
    %38 = vector.extract_strided_slice %36 {offsets = [0, 8], sizes = [8, 8], strides = [1, 1]} : vector<8x24xf32> to vector<8x8xf32>
    %39 = vector.extract_strided_slice %36 {offsets = [0, 16], sizes = [8, 8], strides = [1, 1]} : vector<8x24xf32> to vector<8x8xf32>
    %40 = arith.truncf %37 : vector<8x8xf32> to vector<8x8xbf16>
    %41 = arith.truncf %38 : vector<8x8xf32> to vector<8x8xbf16>
    %cst_18 = arith.constant dense<0.000000e+00> : vector<8x8xf32>
    %42 = tpu.matmul %40, %41, %cst_18 {dimension_numbers = #tpu.dot_dimension_numbers<[1], [1], [0], [0], [0, 0, 1, 0], [], []>} : vector<8x8xbf16>, vector<8x8xbf16>, vector<8x8xf32> -> vector<8x8xf32>
    %cst_19 = arith.constant 0.353553385 : f32
    %43 = vector.broadcast %cst_19 : f32 to vector<8x8xf32>
    %44 = arith.mulf %42, %43 : vector<8x8xf32>
    %cst_20 = arith.constant dense<0xFF800000> : vector<8xf32>
    %45 = vector.multi_reduction <maximumf>, %44, %cst_20 [1] : vector<8x8xf32> to vector<8xf32>
    %46 = vector.shape_cast %45 : vector<8xf32> to vector<8x1xf32>
    %47 = vector.broadcast %46 : vector<8x1xf32> to vector<8x8xf32>
    %48 = arith.subf %44, %47 : vector<8x8xf32>
    %49 = math.exp %48 : vector<8x8xf32>
    %cst_21 = arith.constant dense<0.000000e+00> : vector<8xf32>
    %50 = vector.multi_reduction <add>, %49, %cst_21 [1] : vector<8x8xf32> to vector<8xf32>
    %51 = vector.shape_cast %50 : vector<8xf32> to vector<8x1xf32>
    %52 = tpu.reciprocal %51 {approx = true} : vector<8x1xf32> -> vector<8x1xf32>
    %53 = vector.broadcast %52 : vector<8x1xf32> to vector<8x8xf32>
    %54 = arith.mulf %49, %53 : vector<8x8xf32>
    %55 = arith.truncf %54 : vector<8x8xf32> to vector<8x8xbf16>
    %56 = arith.truncf %39 : vector<8x8xf32> to vector<8x8xbf16>
    %cst_22 = arith.constant dense<0.000000e+00> : vector<8x8xf32>
    %57 = tpu.matmul %55, %56, %cst_22 {dimension_numbers = #tpu.dot_dimension_numbers<[1], [0], [0], [1], [0, 0, 1, 1], [], []>} : vector<8x8xbf16>, vector<8x8xbf16>, vector<8x8xf32> -> vector<8x8xf32>
    %c0_23 = arith.constant 0 : index
    %c0_24 = arith.constant 0 : index
    %58 = vector.load %arg16[%c0_23, %c0_24] : memref<8x32xf32, #tpu.memory_space<vmem>>, vector<8x32xf32>
    %59 = arith.truncf %57 : vector<8x8xf32> to vector<8x8xbf16>
    %c0_25 = arith.constant 0 : index
    %c0_26 = arith.constant 0 : index
    %c0_27 = arith.constant 0 : index
    %60 = vector.load %arg7[%c0_25, %c0_26, %c0_27] : memref<1x8x32xbf16, #tpu.memory_space<vmem>>, vector<1x8x32xbf16>
    %61 = vector.shape_cast %60 : vector<1x8x32xbf16> to vector<8x32xbf16>
    %cst_28 = arith.constant dense<0.000000e+00> : vector<8x32xf32>
    %62 = tpu.matmul %59, %61, %cst_28 {dimension_numbers = #tpu.dot_dimension_numbers<[1], [0], [0], [1], [0, 0, 1, 1], [], []>} : vector<8x8xbf16>, vector<8x32xbf16>, vector<8x32xf32> -> vector<8x32xf32>
    %63 = arith.addf %58, %62 : vector<8x32xf32>
    %c0_29 = arith.constant 0 : index
    %c0_30 = arith.constant 0 : index
    %64 = vector.load %arg16[%c0_29, %c0_30] : memref<8x32xf32, #tpu.memory_space<vmem>>, vector<8x32xf32>
    tpu.vector_store %arg16[%c0_29, %c0_30], %63 {strides = array<i32>} : memref<8x32xf32, #tpu.memory_space<vmem>>, vector<8x32xf32>,
    %c3_i32 = arith.constant 3 : i32
    %65 = arith.cmpi eq, %arg1, %c3_i32 : i32
    %66 = arith.extui %65 : i1 to i32
    %c0_i32_31 = arith.constant 0 : i32
    %67 = arith.cmpi ne, %66, %c0_i32_31 : i32
    scf.if %67 {
      %c0_32 = arith.constant 0 : index
      %c0_33 = arith.constant 0 : index
      %68 = vector.load %arg16[%c0_32, %c0_33] : memref<8x32xf32, #tpu.memory_space<vmem>>, vector<8x32xf32>
      %69 = arith.addf %4, %68 : vector<8x32xf32>
      %c0_34 = arith.constant 0 : index
      %c0_35 = arith.constant 0 : index
      %70 = vector.load %arg8[%c0_34, %c0_35] : memref<1x32xf32, #tpu.memory_space<vmem>>, vector<1x32xf32>
      %71 = vector.broadcast %70 : vector<1x32xf32> to vector<8x32xf32>
      %72 = arith.addf %69, %71 : vector<8x32xf32>
      %cst_36 = arith.constant dense<0.000000e+00> : vector<8xf32>
      %73 = vector.multi_reduction <add>, %72, %cst_36 [1] : vector<8x32xf32> to vector<8xf32>
      %74 = vector.shape_cast %73 : vector<8xf32> to vector<8x1xf32>
      %cst_37 = arith.constant 3.200000e+01 : f32
      %75 = vector.broadcast %cst_37 : f32 to vector<8x1xf32>
      %76 = arith.divf %74, %75 : vector<8x1xf32>
      %77 = vector.broadcast %76 : vector<8x1xf32> to vector<8x32xf32>
      %78 = arith.subf %72, %77 : vector<8x32xf32>
      %79 = arith.mulf %78, %78 : vector<8x32xf32>
      %cst_38 = arith.constant dense<0.000000e+00> : vector<8xf32>
      %80 = vector.multi_reduction <add>, %79, %cst_38 [1] : vector<8x32xf32> to vector<8xf32>
      %81 = vector.shape_cast %80 : vector<8xf32> to vector<8x1xf32>
      %cst_39 = arith.constant 3.200000e+01 : f32
      %82 = vector.broadcast %cst_39 : f32 to vector<8x1xf32>
      %83 = arith.divf %81, %82 : vector<8x1xf32>
      %84 = vector.broadcast %76 : vector<8x1xf32> to vector<8x32xf32>
      %85 = arith.subf %72, %84 : vector<8x32xf32>
      %cst_40 = arith.constant 9.99999974E-6 : f32
      %86 = vector.broadcast %cst_40 : f32 to vector<8x1xf32>
      %87 = arith.addf %83, %86 : vector<8x1xf32>
      %88 = math.rsqrt %87 : vector<8x1xf32>
      %89 = vector.broadcast %88 : vector<8x1xf32> to vector<8x32xf32>
      %90 = arith.mulf %85, %89 : vector<8x32xf32>
      %c0_41 = arith.constant 0 : index
      %c0_42 = arith.constant 0 : index
      %91 = vector.load %arg9[%c0_41, %c0_42] : memref<1x32xf32, #tpu.memory_space<vmem>>, vector<1x32xf32>
      %92 = vector.broadcast %91 : vector<1x32xf32> to vector<8x32xf32>
      %93 = arith.mulf %90, %92 : vector<8x32xf32>
      %c0_43 = arith.constant 0 : index
      %c0_44 = arith.constant 0 : index
      %94 = vector.load %arg10[%c0_43, %c0_44] : memref<1x32xf32, #tpu.memory_space<vmem>>, vector<1x32xf32>
      %95 = vector.broadcast %94 : vector<1x32xf32> to vector<8x32xf32>
      %96 = arith.addf %93, %95 : vector<8x32xf32>
      %97 = arith.truncf %96 : vector<8x32xf32> to vector<8x32xbf16>
      %c0_45 = arith.constant 0 : index
      %c0_46 = arith.constant 0 : index
      %98 = vector.load %arg11[%c0_45, %c0_46] : memref<32x64xbf16, #tpu.memory_space<vmem>>, vector<32x64xbf16>
      %cst_47 = arith.constant dense<0.000000e+00> : vector<8x64xf32>
      %99 = tpu.matmul %97, %98, %cst_47 {dimension_numbers = #tpu.dot_dimension_numbers<[1], [0], [0], [1], [0, 0, 1, 1], [], []>} : vector<8x32xbf16>, vector<32x64xbf16>, vector<8x64xf32> -> vector<8x64xf32>
      %c0_48 = arith.constant 0 : index
      %c0_49 = arith.constant 0 : index
      %100 = vector.load %arg12[%c0_48, %c0_49] : memref<1x64xf32, #tpu.memory_space<vmem>>, vector<1x64xf32>
      %101 = vector.broadcast %100 : vector<1x64xf32> to vector<8x64xf32>
      %102 = arith.addf %99, %101 : vector<8x64xf32>
      %cst_50 = arith.constant 0.000000e+00 : f32
      %103 = vector.broadcast %cst_50 : f32 to vector<8x64xf32>
      %104 = arith.maximumf %102, %103 : vector<8x64xf32>
      %105 = arith.truncf %104 : vector<8x64xf32> to vector<8x64xbf16>
      %c0_51 = arith.constant 0 : index
      %c0_52 = arith.constant 0 : index
      %106 = vector.load %arg13[%c0_51, %c0_52] : memref<64x32xbf16, #tpu.memory_space<vmem>>, vector<64x32xbf16>
      %cst_53 = arith.constant dense<0.000000e+00> : vector<8x32xf32>
      %107 = tpu.matmul %105, %106, %cst_53 {dimension_numbers = #tpu.dot_dimension_numbers<[1], [0], [0], [1], [0, 0, 1, 1], [], []>} : vector<8x64xbf16>, vector<64x32xbf16>, vector<8x32xf32> -> vector<8x32xf32>
      %c0_54 = arith.constant 0 : index
      %c0_55 = arith.constant 0 : index
      %108 = vector.load %arg14[%c0_54, %c0_55] : memref<1x32xf32, #tpu.memory_space<vmem>>, vector<1x32xf32>
      %109 = vector.broadcast %108 : vector<1x32xf32> to vector<8x32xf32>
      %110 = arith.addf %107, %109 : vector<8x32xf32>
      %111 = arith.addf %72, %110 : vector<8x32xf32>
      %c0_56 = arith.constant 0 : index
      %c0_57 = arith.constant 0 : index
      %c0_58 = arith.constant 0 : index
      %112 = vector.load %arg15[%c0_56, %c0_57, %c0_58] : memref<1x8x32xf32, #tpu.memory_space<vmem>>, vector<1x8x32xf32>
      %113 = vector.shape_cast %112 : vector<1x8x32xf32> to vector<8x32xf32>
      %114 = vector.shape_cast %111 : vector<8x32xf32> to vector<1x8x32xf32>
      tpu.vector_store %arg15[%c0_56, %c0_57, %c0_58], %114 {strides = array<i32>} : memref<1x8x32xf32, #tpu.memory_space<vmem>>, vector<1x8x32xf32>,
    } else {
    }
    return
  }
  func.func @transform_0(%arg0: i32, %arg1: i32) -> (i32, i32, i32) {
    %c0_i32 = arith.constant 0 : i32
    %c0_i32_0 = arith.constant 0 : i32
    %c0_i32_1 = arith.constant 0 : i32
    return %arg0, %c0_i32, %c0_i32_0 : i32, i32, i32
  }
  func.func @transform_1(%arg0: i32, %arg1: i32) -> (i32, i32) {
    %c0_i32 = arith.constant 0 : i32
    %c0_i32_0 = arith.constant 0 : i32
    %c0_i32_1 = arith.constant 0 : i32
    return %c0_i32, %c0_i32_0 : i32, i32
  }
  func.func @transform_2(%arg0: i32, %arg1: i32) -> (i32, i32) {
    %c0_i32 = arith.constant 0 : i32
    %c0_i32_0 = arith.constant 0 : i32
    %c0_i32_1 = arith.constant 0 : i32
    return %c0_i32, %c0_i32_0 : i32, i32
  }
  func.func @transform_3(%arg0: i32, %arg1: i32) -> (i32, i32, i32) {
    %c0_i32 = arith.constant 0 : i32
    %c0_i32_0 = arith.constant 0 : i32
    %c0_i32_1 = arith.constant 0 : i32
    return %arg1, %c0_i32, %c0_i32_0 : i32, i32, i32
  }
  func.func @transform_4(%arg0: i32, %arg1: i32) -> (i32, i32, i32) {
    %c0_i32 = arith.constant 0 : i32
    %c0_i32_0 = arith.constant 0 : i32
    %c0_i32_1 = arith.constant 0 : i32
    return %arg1, %c0_i32, %c0_i32_0 : i32, i32, i32
  }
  func.func @transform_5(%arg0: i32, %arg1: i32) -> (i32, i32, i32) {
    %c0_i32 = arith.constant 0 : i32
    %c0_i32_0 = arith.constant 0 : i32
    %c0_i32_1 = arith.constant 0 : i32
    return %arg1, %c0_i32, %c0_i32_0 : i32, i32, i32
  }
  func.func @transform_6(%arg0: i32, %arg1: i32) -> (i32, i32) {
    %c0_i32 = arith.constant 0 : i32
    %c0_i32_0 = arith.constant 0 : i32
    %c0_i32_1 = arith.constant 0 : i32
    return %c0_i32, %c0_i32_0 : i32, i32
  }
  func.func @transform_7(%arg0: i32, %arg1: i32) -> (i32, i32) {
    %c0_i32 = arith.constant 0 : i32
    %c0_i32_0 = arith.constant 0 : i32
    %c0_i32_1 = arith.constant 0 : i32
    return %c0_i32, %c0_i32_0 : i32, i32
  }
  func.func @transform_8(%arg0: i32, %arg1: i32) -> (i32, i32) {
    %c0_i32 = arith.constant 0 : i32
    %c0_i32_0 = arith.constant 0 : i32
    %c0_i32_1 = arith.constant 0 : i32
    return %c0_i32, %c0_i32_0 : i32, i32
  }
  func.func @transform_9(%arg0: i32, %arg1: i32) -> (i32, i32) {
    %c0_i32 = arith.constant 0 : i32
    %c0_i32_0 = arith.constant 0 : i32
    %c0_i32_1 = arith.constant 0 : i32
    return %c0_i32, %c0_i32_0 : i32, i32
  }
  func.func @transform_10(%arg0: i32, %arg1: i32) -> (i32, i32) {
    %c0_i32 = arith.constant 0 : i32
    %c0_i32_0 = arith.constant 0 : i32
    %c0_i32_1 = arith.constant 0 : i32
    return %c0_i32, %c0_i32_0 : i32, i32
  }
  func.func @transform_11(%arg0: i32, %arg1: i32) -> (i32, i32) {
    %c0_i32 = arith.constant 0 : i32
    %c0_i32_0 = arith.constant 0 : i32
    %c0_i32_1 = arith.constant 0 : i32
    return %c0_i32, %c0_i32_0 : i32, i32
  }
  func.func @transform_12(%arg0: i32, %arg1: i32) -> (i32, i32) {
    %c0_i32 = arith.constant 0 : i32
    %c0_i32_0 = arith.constant 0 : i32
    %c0_i32_1 = arith.constant 0 : i32
    return %c0_i32, %c0_i32_0 : i32, i32
  }
  func.func @transform_13(%arg0: i32, %arg1: i32) -> (i32, i32, i32) {
    %c0_i32 = arith.constant 0 : i32
    %c0_i32_0 = arith.constant 0 : i32
    %c0_i32_1 = arith.constant 0 : i32
    return %arg0, %c0_i32, %c0_i32_0 : i32, i32, i32
  }
}

</mosaic_0001>

<bundles_post_ra>
// kernel: tpu_custom_call.1
= control target key start
LH: loop header
LB: loop body
LE: loop exit
PB: predicated region body
PF: predicated region fallthrough
CT: control target
= control target key end

     0   :  { %s1678_s0 = inlined_call_operand.vmem [shape: f32[2,8,32], index: 0, kind: input, shape index: {}]   ;;  %s1679_s1 = inlined_call_operand.vmem [shape: f32[1,32], index: 1, kind: input, shape index: {}]   ;;  %s1680_s2 = inlined_call_operand.vmem [shape: f32[1,32], index: 2, kind: input, shape index: {}]   ;;  %s1681_s3 = inlined_call_operand.vmem [shape: bf16[4,32,24], index: 3, kind: input, shape index: {}]   ;;  %s1682_s4 = inlined_call_operand.vmem [shape: f32[4,1,24], index: 4, kind: input, shape index: {}]   ;;  %s1683_s5 = inlined_call_operand.vmem [shape: bf16[4,8,32], index: 5, kind: input, shape index: {}]   ;;  %s1684_s6 = inlined_call_operand.vmem [shape: f32[1,32], index: 6, kind: input, shape index: {}]   ;;  %s1685_s7 = inlined_call_operand.vmem [shape: f32[1,32], index: 7, kind: input, shape index: {}]   ;;  %s1686_s8 = inlined_call_operand.vmem [shape: f32[1,32], index: 8, kind: input, shape index: {}]   ;;  %s1687_s9 = inlined_call_operand.vmem [shape: bf16[32,64], index: 9, kind: input, shape index: {}]   ;;  %s1688_s10 = inlined_call_operand.vmem [shape: f32[1,64], index: 10, kind: input, shape index: {}]   ;;  %s1689_s11 = inlined_call_operand.vmem [shape: bf16[64,32], index: 11, kind: input, shape index: {}]   ;;  %s1690_s12 = inlined_call_operand.vmem [shape: f32[1,32], index: 12, kind: input, shape index: {}]   ;;  %s1691_s13 = inlined_call_operand.hbm [shape: f32[2,8,32], index: 13, kind: output, shape index: {}]  }
   0x1   :  { %1706 = sst [smem:[#allocation18_spill]] %s1690_s12 }
   0x2   :  { %1707 = sst [smem:[#allocation19_spill]] %s1691_s13 }
   0x3   :  { %18 = vsyncpa [#allocation4], 0 }
   0x4   :  { %20 = vsyncpa [#allocation4 + $0x1], 0  ;;  %s1453_s25 = smov 0   ;;  %s1455_s26 = smov 0  }
   0x5   :  { %s1457_s27 = smov 0   ;;  %s1459_s28 = smov 0  }
   0x6   :  { %s1461_s29 = smov 0   ;;  %s1463_s30 = smov 0  }
   0x7   :  { %s1465_s14 = smov 0   ;;  %s1467_s15 = smov 0  }
   0x8 LB: > { %1708 = sst [smem:[#allocation6_spill]] %s1345_s25  ;;  %s1083_s16 = sadd.s32 4294967295, %s1373_s15   ;;  %s1373_s15 = sphi %s1467_s15, %s26_s15   ;;  %s1369_s14 = sphi %s1465_s14, %s1738_s14   ;;  %s1365_s30 = sphi %s1463_s30, %s1737_s30   ;;  %s1361_s29 = sphi %s1461_s29, %s1736_s29   ;;  %s1357_s28 = sphi %s1459_s28, %s1735_s28   ;;  %s1353_s27 = sphi %s1457_s27, %s1734_s27   ;;  %s1349_s26 = sphi %s1455_s26, %s1733_s26   ;;  %s1345_s25 = sphi %s1453_s25, %s1732_s25  }
   0x9   : > { %1709 = sst [smem:[#allocation7_spill]] %s1349_s26  ;;  %s1084_s17 = sadd.s32 4294967294, %s1373_s15  }
   0xa   : > { %1710 = sst [smem:[#allocation8_spill]] %s1353_s27  ;;  %s35_s18 = sadd.s32 1, %s1365_s30 }
   0xb   : > { %1711 = sst [smem:[#allocation9_spill]] %s1361_s29  ;;  %p36_p0 = scmp.ge.s32.totalorder %s35_s18, 4 }
   0xc   : > { %1712 = sst [smem:[#allocation10_spill]] %s1365_s30  ;;  %s38_s19 = sadd.s32 1, %s1369_s14 }
   0xd   : > { %1713 = sst [smem:[#allocation11_spill]] %s1369_s14  ;;  %p348_p1 = scmp.ne.s32.totalorder %s1353_s27, %s1349_s26 }
   0xe   : > { %1714 = sst [smem:[#allocation12_spill]] %s1373_s15  ;;  %p349_p2 = scmp.eq.s32.totalorder %s1083_s16, 7 }
   0xf   : > { %s1740_s18 = smov (%p36_p0, %s35_s18), 0  ;;  %s1742_s19 = smov (!%p36_p0, %s38_s19), %s1369_s14 }
  0x10   : > { %1715 = sst [smem:[#allocation13_spill]] %s1740_s18  ;;  %p1502_p3 = por %p349_p2, %p348_p1 }
  0x11   : > { %p354_p4 = scmp.ne.s32.totalorder %s1349_s26, %s1345_s25  ;;  %p40_p5 = scmp.ge.s32.totalorder %s1742_s19, 2 }
  0x12   : > { %s1716_s20 = scalar_select %p1502_p3, 1, 0 }
  0x13   : > { %p355_p6 = scmp.eq.s32.totalorder %s1084_s17, 7  ;;  %p1087_p7 = scmp.ge.s32.totalorder %s1373_s15, 1 }
  0x14   : > { %1717 = sst [smem:[#allocation14_spill]] %s1716_s20  ;;  %p428_p8 = scmp.lt.s32.totalorder %s1373_s15, 9 }
  0x15   : > { %s1744_s19 = smov (%p40_p5, %s1742_s19), 0  ;;  %p1512_p9 = por %p355_p6, %p354_p4 }
  0x16   : > { %1718 = sst [smem:[#allocation15_spill]] %s1744_s19  ;;  %p429_p10 = pnand %p1087_p7, %p428_p8 }
  0x17   : > { %s1719_s21 = scalar_select %p1512_p9, 1, 0 }
  0x18   : > { %s335_s22 = ssub.s32 %s1369_s14, %s1744_s19  ;;  %s338_s23 = sadd.s32 1, %s1353_s27 }
  0x19   : > { %1720 = sst [smem:[#allocation16_spill]] %s1719_s21  ;;  %p336_p11 = scmp.eq.s32.totalorder %s335_s22, 0 }
  0x1a   : > { %432 = sbr.rel (%p429_p10) target bundleno = 2446 (0x98e), region = 72  ;;  %s1698_s16 = sand.u32 (!%p429_p10), 1, %s1349_s26  }
  0x1b   : > { %s1520_s24 = scalar_select %p336_p11, %s1353_s27, %s338_s23  }
  0x1c   : > { %p483_p12 = scmp.lt.s32.totalorder (!%p429_p10), %s1361_s29, 1  ;;  %s1526_s17 = sshll.u32 (!%p429_p10), %s1698_s16, 3 }
  0x1d   : > { %1721 = sst [smem:[#allocation17_spill]] %s1520_s24  ;;  %p487_p13 = scmp.lt.s32.totalorder (!%p429_p10), %s1357_s28, 3 }
  0x1e   : > { %p1093_p0 = scmp.ne.s32.totalorder (!%p429_p10), %s1357_s28, 0 }
  0x21   : > { %s484_s18 = scalar_select %p483_p12, %s1361_s29, 1 }
  0x22   : > { %s1531_s19 = scalar_select %p487_p13, %s1357_s28, 3 }
  0x23   : > { %s1089_s22 = sshll.u32 %s484_s18, 3  ;;  %s482_s18 = scalar_lea.vmem [#allocation3], %s1526_s17  ;;  %vm504_vm0 = vcmask (!%p1093_p0), 261120   ;;  %v1375_v0 = vmov (!%p1093_p0), 0.0  }
  0x24   : > { %s486_s30 = scalar_lea.vmem %s1678_s0, %s1089_s22  ;;  %s1121_s24 = sshll.u32 %s1531_s19, 4  ;;  %505 = vst.msk [vmem:[#allocation2] sm:$0xff] (!%p1093_p0), %vm504_vm0, %v1375_v0 }
  0x25   : > { %s491_s25 = scalar_lea.vmem %s1681_s3, %s1121_s24  ;;  %s494_s13 = scalar_lea.vmem %s1682_s4, %s1531_s19 }
  0x26   : > { %s1092_s20 = sshll.u32 %s1531_s19, 2  ;;  %503 = sbr.rel (%p1093_p0) target bundleno = 45 (0x2d), region = 76 }
  0x27   : > { %s1548_s12 = scalar_lea.vmem %s1683_s5, %s1092_s20 }
  0x2d PF: > { %v1552_v1 = vld [vmem:[%s486_s30] sm:$0xff]  ;;  %vm507_vm1 = vcmask 261120   ;;  %v1376_v9 = vmov 0.0   ;;  %vm1377_vm2 = vmmov 0   ;;  %v1264_v10 = vld [vmem:[%s491_s25 + $0x8] sm:$0xff]   ;;  %s1378_s15 = smov 120  }
  0x2e   : > { %v508_v2 = vsel %vm507_vm1, %v1552_v1, 0.0  ;;  %v1263_v8 = vld [vmem:[%s491_s25] sm:$0xff]   ;;  %1139 = vmatprep.subr.bf16.mxu0 %v1376_v9  ;;  %1143 = vmatprep.mubr.msk.bf16.mxu0 %vm1377_vm2, %v1376_v9  ;;  %vm609_vm3 = vcmask 64512   ;;  %vm674_vm4 = vcmask 1043456   ;;  %p1103_p1 = scmp.ne.s32.totalorder %s1357_s28, 3 }
  0x2f   : > { %509 = vadd.xlane.f32.xlu0 %v508_v2  ;;  %1140 = vmatpush3.bf16.msra.mxu0 %v1263_v8  ;;  %v1094_v15 = vld [vmem:[%s1679_s1] ss:$0 sm:$0xff]  ;;  %v1380_v8 = vmov (!%p1103_p1), 0.0   ;;  %vm1381_vm5 = vmmov (!%p1103_p1), 0   ;;  %vm920_vm6 = vcmask (!%p1103_p1), 523264   ;;  %s1722_s24 = sld [smem:[#allocation18_spill]] (!%p1103_p1) }
  0x30   : > { %1147 = vmatprep.subr.bf16.mxu1 %v1376_v9  ;;  %1141 = vmatprep.subr.bf16.mxu0 %v1376_v9  ;;  %v1095_v17 = vld [vmem:[%s1680_s2] ss:$0 sm:$0xff] }
  0x31   : > { %1149 = vmatprep.mubr.msk.bf16.mxu1 %vm1377_vm2, %v1376_v9  ;;  %v1096_v21 = vld [vmem:[%s494_s13] ss:$0 sm:$0xff]  ;;  %s1379_s13 = smov 112  }
  0x32   : > { %v720_v41 = vld [vmem:[%s1548_s12] sm:$0xf] }
  0x33   : > { %1142 = vmatpush3.bf16.msra.mxu0 %v1264_v10  ;;  %v725_v42 = vsel %vm674_vm4, %v720_v41, 0  ;;  %v718_v54 = vld [vmem:[#allocation2] sm:$0xff]  ;;  %v1274_v10 = vld [vmem:[%s1689_s11 + $0x8] sm:$0xff] (!%p1103_p1)  }
  0x34   : > { %1153 = vmatprep.subr.bf16.mxu0 %v1376_v9  ;;  %v1104_v61 = vld [vmem:[%s1684_s6] ss:$0 sm:$0xff] (!%p1103_p1) }
  0xbc   : > { %v510_v3 = vpop.xlane.xlu0 %509 }
  0xbd   : > { %v512_v4 = vmul.f32 0.03125, %v510_v3 }
  0xbf   : > { %v513_v5 = vsub.f32 %v1552_v1, %v512_v4 }
  0xc1   : > { %v514_v6 = vmul.f32 %v513_v5, %v513_v5 }
  0xc3   : > { %v515_v7 = vsel %vm507_vm1, %v514_v6, 0.0 }
  0xc4   : > { %516 = vadd.xlane.f32.xlu0 %v515_v7  ;;  %v1271_v7 = vld [vmem:[%s1687_s9] sm:$0xff] (!%p1103_p1)  }
 0x151   : > { %v517_v11 = vpop.xlane.xlu0 %516 }
 0x152   : > { %v518_v12 = vmul.f32 0.03125, %v517_v11 }
 0x154   : > { %v519_v13 = vadd.f32 1e-05, %v518_v12 }
 0x156   : > { %1265 = vrsqrt.f32 %v519_v13 }
 0x160   : > { %v1266_v14 = vpop.eup %1265 }
 0x161   : > { %v521_v16 = vmul.f32 %v1266_v14, %v513_v5 }
 0x163   : > { %v529_v18 = vmul.f32 %v1094_v15, %v521_v16  ;;  %v1105_v15 = vld [vmem:[%s1685_s7] ss:$0 sm:$0xff] (!%p1103_p1) }
 0x165   : > { %v537_v19 = vadd.f32 %v1095_v17, %v529_v18  ;;  %v1106_v17 = vld [vmem:[%s1686_s8] ss:$0 sm:$0xff] (!%p1103_p1) }
 0x167   : > { %v538_v20 = vpack.c.bf16 %v537_v19, %v537_v19 }
 0x169   : > { %1144 = vmatmul.mubr.msk.bf16.vlgmr.msra.gmra.mrb[0].mxu0 %vm507_vm1, %v538_v20 }
 0x16a   : > { %1155 = vmatprep.mubr.msk.bf16.mxu0 %vm1377_vm2, %v1376_v9 }
 0x23c   : > { %v599_v22 = vpop.f32.mrb[0].mxu0 }
 0x23d   : > { %v600_v23 = vadd.f32 %v1096_v21, %v599_v22  ;;  %v1145_v24 = vpop.f32.mrb[1].mxu0  ;;  %v1275_v21 = vld [vmem:[%s1689_s11 + $0x10] sm:$0xff] (!%p1103_p1)   ;;  %v1276_v22 = vld [vmem:[%s1689_s11 + $0x18] sm:$0xff] (!%p1103_p1)  }
 0x23e   : > { %v602_v25 = vpop.f32.mrb[2].mxu0 }
 0x23f   : > { %v605_v26 = vpack.c.bf16 %v600_v23, %v600_v23  ;;  %v1146_v27 = vpop.f32.mrb[3].mxu0  ;;  %v1107_v23 = vld [vmem:[%s1688_s10] ss:$0 sm:$0xff] (!%p1103_p1) }
 0x241   : > { %607 = vrot.lane.b32.xlu1 %v605_v26, %s1378_s15 }
 0x2b3   : > { %v608_v28 = vpop.permute.xlu1 %607 }
 0x2b4   : > { %v614_v29 = vsel %vm609_vm3, %v608_v28, 0 }
 0x2b5   : > { %1148 = vmatpush3.bf16.xpose.msra.mxu1 %v614_v29 }
 0x2b6   : > { %1159 = vmatprep.subr.bf16.mxu1 %v1376_v9 }
 0x2bc   : > { %1150 = vmatmul.mubr.msk.bf16.vlgmr.msra.gmra.mrb[0].mxu1 %vm609_vm3, %v605_v26 }
 0x2bd   : > { %1161 = vmatprep.mubr.msk.bf16.mxu1 %vm1377_vm2, %v1376_v9  ;;  %1160 = vmatpush3.bf16.msra.mxu1 %v725_v42  ;;  %v1273_v9 = vld [vmem:[%s1689_s11] sm:$0xff] (!%p1103_p1)  }
 0x2be   : > { %1173 = vmatprep.subr.bf16.mxu1 (!%p1103_p1), %v1380_v8 }
 0x38f   : > { %v650_v30 = vpop.f32.mrb[0].mxu1 }
 0x390   : > { %v656_v31 = vmul.f32 0.35355338, %v650_v30  ;;  %v1151_v32 = vpop.f32.mrb[1].mxu1 }
 0x391   : > { %v653_v33 = vpop.f32.mrb[2].mxu1 }
 0x392   : > { %v1152_v34 = vpop.f32.mrb[3].mxu1  ;;  %v657_v35 = vsel %vm609_vm3, %v656_v31, -inf }
 0x393   : > { %658 = vmax.xlane.f32.xlu1 %v657_v35 }
 0x420   : > { %v659_v36 = vpop.xlane.xlu1 %658 }
 0x421   : > { %v660_v37 = vsub.f32 %v656_v31, %v659_v36  ;;  %v1111_v31 = vld [vmem:[%s1722_s24] ss:$0 sm:$0xff] (!%p1103_p1) }
 0x423   : > { %v661_v38 = vmul.f32 1.442695, %v660_v37 }
 0x425   : > { %1267 = vpow2.f32 %v661_v38 }
 0x42f   : > { %v1268_v39 = vpop.eup %1267 }
 0x430   : > { %v663_v40 = vsel %vm609_vm3, %v1268_v39, 0.0 }
 0x431   : > { %664 = vadd.xlane.f32.xlu0 %v663_v40 }
 0x447   : > { %669 = vrot.lane.b32.xlu0 %v605_v26, %s1379_s13 }
 0x4be   : > { %v665_v43 = vpop.xlane.xlu0 %664 }
 0x4bf   : > { %1269 = vrcp.f32 %v665_v43 }
 0x4c2   : > { %v670_v44 = vpop.permute.xlu0 %669 }
 0x4c3   : > { %v676_v45 = vsel %vm674_vm4, %v670_v44, 0 }
 0x4c4   : > { %1154 = vmatpush3.bf16.msra.mxu0 %v676_v45 }
 0x4c5   : > { %1165 = vmatprep.subr.bf16.mxu0 (!%p1103_p1), %v1380_v8 }
 0x4c9   : > { %v1270_v46 = vpop.eup %1269 }
 0x4ca   : > { %v667_v47 = vmul.f32 %v1270_v46, %v1268_v39 }
 0x4cc   : > { %v668_v48 = vpack.c.bf16 %v667_v47, %v667_v47 }
 0x4ce   : > { %1156 = vmatmul.mubr.msk.bf16.vlgmr.msra.gmra.mrb[4].mxu0 %vm609_vm3, %v668_v48 }
 0x4cf   : > { %1169 = vmatprep.mubr.msk.bf16.mxu0 (!%p1103_p1), %vm1381_vm5, %v1380_v8  ;;  %1166 = vmatpush3.bf16.msra.mxu0 (!%p1103_p1), %v1271_v7 }
 0x4d0   : > { %1167 = vmatprep.subr.bf16.mxu0 (!%p1103_p1), %v1380_v8 }
 0x5a1   : > { %v712_v49 = vpop.f32.mrb[4].mxu0 }
 0x5a2   : > { %v719_v50 = vpack.c.bf16 %v712_v49, %v712_v49  ;;  %v1157_v51 = vpop.f32.mrb[5].mxu0 }
 0x5a3   : > { %v715_v52 = vpop.f32.mrb[6].mxu0 }
 0x5a4   : > { %v1158_v53 = vpop.f32.mrb[7].mxu0  ;;  %1162 = vmatmul.mubr.msk.bf16.vlgmr.msra.gmra.mrb[4].mxu1 %vm609_vm3, %v719_v50 }
 0x5a5   : > { %1181 = vmatprep.mubr.msk.bf16.mxu1 (!%p1103_p1), %vm1381_vm5, %v1380_v8  ;;  %1174 = vmatpush3.bf16.msra.mxu1 (!%p1103_p1), %v1273_v9 }
 0x5a6   : > { %1175 = vmatprep.subr.bf16.mxu1 (!%p1103_p1), %v1380_v8 }
 0x5a9   : > { %1176 = vmatpush3.bf16.msra.mxu1 (!%p1103_p1), %v1274_v10 }
 0x5aa   : > { %1177 = vmatprep.subr.bf16.mxu1 (!%p1103_p1), %v1380_v8 }
 0x5ad   : > { %1178 = vmatpush3.bf16.msra.mxu1 (!%p1103_p1), %v1275_v21 }
 0x5ae   : > { %1179 = vmatprep.subr.bf16.mxu1 (!%p1103_p1), %v1380_v8 }
 0x5b1   : > { %1180 = vmatpush3.bf16.msra.mxu1 (!%p1103_p1), %v1276_v22 }
 0x674   : > { %772 = sbr.rel (%p1103_p1) target bundleno = 2420 (0x974), region = 80 }
 0x677   : > { %v761_v55 = vpop.f32.mrb[4].mxu1 }
 0x678   : > { %v767_v56 = vadd.f32 %v761_v55, %v718_v54  ;;  %v1163_v57 = vpop.f32.mrb[5].mxu1 }
 0x679   : > { %v764_v58 = vpop.f32.mrb[6].mxu1 }
 0x67a   : > { %768 = vst.msk [vmem:[#allocation2] sm:$0xff] %vm507_vm1, %v767_v56  ;;  %v1164_v59 = vpop.f32.mrb[7].mxu1 }
 0x681   : > { %v773_v60 = vld [vmem:[#allocation2] sm:$0xff] }
 0x682   : > { %v774_v62 = vadd.f32 %v773_v60, %v1552_v1  ;;  %v1272_v1 = vld [vmem:[%s1687_s9 + $0x8] sm:$0xff]  }
 0x683   : > { %1168 = vmatpush3.bf16.msra.mxu0 %v1272_v1 }
 0x684   : > { %v782_v63 = vadd.f32 %v1104_v61, %v774_v62 }
 0x686   : > { %v783_v0 = vsel %vm507_vm1, %v782_v63, 0.0 }
 0x687   : > { %784 = vadd.xlane.f32.xlu0 %v783_v0 }
 0x714   : > { %v785_v2 = vpop.xlane.xlu0 %784 }
 0x715   : > { %v786_v3 = vmul.f32 0.03125, %v785_v2 }
 0x717   : > { %v787_v4 = vsub.f32 %v782_v63, %v786_v3 }
 0x719   : > { %v788_v5 = vmul.f32 %v787_v4, %v787_v4 }
 0x71b   : > { %v789_v6 = vsel %vm507_vm1, %v788_v5, 0.0 }
 0x71c   : > { %790 = vadd.xlane.f32.xlu0 %v789_v6 }
 0x7a9   : > { %v791_v11 = vpop.xlane.xlu0 %790 }
 0x7aa   : > { %v792_v12 = vmul.f32 0.03125, %v791_v11 }
 0x7ac   : > { %v793_v13 = vadd.f32 1e-05, %v792_v12 }
 0x7ae   : > { %1277 = vrsqrt.f32 %v793_v13 }
 0x7b8   : > { %v1278_v14 = vpop.eup %1277 }
 0x7b9   : > { %v795_v16 = vmul.f32 %v1278_v14, %v787_v4 }
 0x7bb   : > { %v803_v18 = vmul.f32 %v1105_v15, %v795_v16 }
 0x7bd   : > { %v811_v19 = vadd.f32 %v1106_v17, %v803_v18 }
 0x7bf   : > { %v812_v20 = vpack.c.bf16 %v811_v19, %v811_v19 }
 0x7c1   : > { %1170 = vmatmul.mubr.msk.bf16.vlgmr.msra.gmra.mrb[0].mxu0 %vm507_vm1, %v812_v20 }
 0x894   : > { %v873_v24 = vpop.f32.mrb[0].mxu0 }
 0x895   : > { %v874_v25 = vadd.f32 %v1107_v23, %v873_v24  ;;  %v1171_v26 = vpop.f32.mrb[1].mxu0 }
 0x896   : > { %v876_v27 = vpop.f32.mrb[2].mxu0 }
 0x897   : > { %v879_v28 = vmax.f32 %v874_v25, 0.0  ;;  %v1172_v29 = vpop.f32.mrb[3].mxu0 }
 0x899   : > { %v880_v30 = vpack.c.bf16 %v879_v28, %v879_v28 }
 0x89b   : > { %1182 = vmatmul.mubr.msk.bf16.vlgmr.msra.gmra.mrb[0].mxu1 %vm920_vm6, %v880_v30 }
 0x96e   : > { %v958_v32 = vpop.f32.mrb[0].mxu1 }
 0x96f   : > { %v959_v33 = vadd.f32 %v1111_v31, %v958_v32  ;;  %v1183_v34 = vpop.f32.mrb[1].mxu1 }
 0x970   : > { %v961_v35 = vpop.f32.mrb[2].mxu1 }
 0x971   : > { %v964_v36 = vadd.f32 %v959_v33, %v782_v63  ;;  %v1184_v37 = vpop.f32.mrb[3].mxu1 }
 0x973   : > { %965 = vst.msk [vmem:[%s482_s18] sm:$0xff] %vm507_vm1, %v964_v36 }
 0x974 PF: > { %s1723_s16 = sld [smem:[#allocation9_spill]]  ;;  %s1726_s30 = sld [smem:[#allocation19_spill]] }
 0x975   : > { %s1724_s22 = sld [smem:[#allocation7_spill]]  ;;  %s980_s14 = sshll.u32 %s482_s18, 4  ;;  %s981_s14 = int_to_ptr.vmem [resolvable:$true] %s980_s14 }
 0x976   : > { %s1279_s19 = scalar_lea.vmem %s981_s14, 128  ;;  %s1382_s28 = smov [#allocation3]  }
 0x977   : > { %p1280_p2 = scmp.ne.s32.totalorder %s981_s14, %s1279_s19  ;;  %s1283_s20 = sshll.u32 %s1382_s28, 4  ;;  %s1284_s20 = int_to_ptr.vmem [resolvable:$false] %s1283_s20 }
 0x978   : > { %s1285_s21 = scalar_lea.vmem %s1284_s20, 256  ;;  %p1286_p6 = scmp.lt.s32.totalorder %s981_s14, %s1284_s20 }
 0x979   : > { %p1281_p4 = pnand %p1280_p2, %p1502_p3  ;;  %p1287_p7 = scmp.lt.s32.totalorder %s1285_s21, %s1279_s19 }
 0x97a   : > { %s1118_s26 = sshll.u32 %s1723_s16, 7  ;;  %s1727_s13 = smov %s1726_s30 }
 0x97b   : > { %s1627_s25 = scalar_lea.hbm %s1726_s30, %s1118_s26  ;;  %s1728_s15 = sand.u32 1, %s1724_s22  }
 0x97c   : > { %s967_s12 = scalar_lea.sflag [#allocation4], %s1728_s15  ;;  %p1282_p5 = pneg %p1281_p4 }
 0x97d   : > { %p1288_p8 = por %p1287_p7, %p1286_p6 }
 0x97f   : > { %p1289_p10 = pnand %p1288_p8, %p1282_p5 }
 0x981   : > { %1292 = shalt.err (!%p1289_p10)
}
 0x982   : > { %s1293_s17 = scalar_lea.hbm %s1627_s25, 128  ;;  %s1297_s16 = scalar_lea.hbm %s1727_s13, 256 }
 0x983   : > { %p1294_p11 = scmp.ne.s32.totalorder %s1627_s25, %s1293_s17  ;;  %p1298_p0 = scmp.lt.u32.totalorder %s1627_s25, %s1727_s13 }
 0x984   : > { %p1299_p1 = scmp.lt.u32.totalorder %s1297_s16, %s1293_s17  ;;  %p1301_p4 = scmp.lt.u32.totalorder %s1293_s17, %s1627_s25 }
 0x985   : > { %p1295_p12 = pnand %p1294_p11, %p1502_p3 }
 0x986   : > { %p1300_p2 = por %p1299_p1, %p1298_p0 }
 0x987   : > { %p1296_p13 = pneg %p1295_p12 }
 0x988   : > { %p1302_p5 = por %p1301_p4, %p1300_p2 }
 0x98a   : > { %p1303_p6 = pnand %p1302_p5, %p1296_p13 }
 0x98c   : > { %1306 = shalt.err (!%p1303_p6)
}
 0x98d   : > { %1185 = dma.vmem_to_hbm [thread:$0]  (%p1502_p3), %s981_s14, 128, %s1627_s25, %s967_s12  }
 0x98e PF: > { %s1729_s27 = sld [smem:[#allocation12_spill]]  ;;  %s1730_s29 = sld [smem:[#allocation6_spill]] }
 0x994   : > { %p1191_p7 = scmp.ge.s32.totalorder %s1729_s27, 2  ;;  %s992_s15 = sand.u32 1, %s1730_s29  }
 0x995   : > { %s993_s19 = scalar_lea.sflag [#allocation4], %s992_s15 }
 0x996   : > { %p1188_p8 = pnand %p1191_p7, %p1512_p9 }
 0x998   : > { %1340 = dma.done.wait (!%p1188_p8), %s993_s19, 128  }
 0x999   : > { %1342 = vsyncadd (!%p1188_p8), %s993_s19, 4294967168  ;;  %s26_s15 = sadd.s32 1, %s1729_s27   ;;  %s1732_s25 = sld [smem:[#allocation7_spill]] }
 0x99a   : > { %p23_p10 = scmp.ge.s32.totalorder %s26_s15, 10   ;;  %s1733_s26 = sld [smem:[#allocation8_spill]] }
 0x99b   : > { %s1734_s27 = sld [smem:[#allocation17_spill]]  ;;  %s1735_s28 = sld [smem:[#allocation10_spill]] }
 0x99c   : > { %s1736_s29 = sld [smem:[#allocation11_spill]]  ;;  %s1737_s30 = sld [smem:[#allocation13_spill]] }
 0x99d   : > { %s1738_s14 = sld [smem:[#allocation15_spill]]  ;;  %25 = sbr.rel (!%p23_p10) target bundleno = 8 (0x8), region = 124 }
 0x9a4   :  { %998 = vsyncpa [#allocation4], 1 }
 0x9a5   :  { %1000 = vsyncpa [#allocation4 + $0x1], 1 }

</bundles_post_ra>
